<compile_context>
chip_gen: v6e
topology: v6e:2x2x1
jax: 0.10.0
libtpu: 0.0.40
codegen_flags: <defaults>
</compile_context>

<pallas_src>
import functools

import jax
import jax.numpy as jnp
from jax.experimental import pallas as pl
from jax.experimental.pallas import tpu as pltpu


def lstm_disc_kernel(x_ref, wg_ref, bg_ref, w1_ref, b1_ref, w2_ref,
                     logit_ref, inter_ref, *, hidden_dim):
    H = hidden_dim
    x = x_ref[...]                                                  # (TB, D)

    # ---- fused single-step LSTM cell (h0 = c0 = 0) ----
    # Gate columns packed as [i | o | g | pad]; i/o columns pre-scaled by 0.5
    # in pack_params so one full-width tanh yields all three gates.
    # Pad columns are zero -> tanh(0) = 0, harmless.
    gates = jnp.dot(x, wg_ref[...], preferred_element_type=jnp.float32) + bg_ref[...]
    t = jnp.tanh(gates)                                             # single EUP pass
    io = 0.5 * t[:, :2 * H] + 0.5                                   # sigmoid(i), sigmoid(o)
    i_g = io[:, :H]
    o_g = io[:, H:2 * H]
    g_g = t[:, 2 * H:3 * H]
    h = o_g * jnp.tanh(i_g * g_g)                                   # (TB, H)

    # ---- linear_1 + LeakyReLU(0.1) ----
    z1 = jnp.dot(h, w1_ref[...], preferred_element_type=jnp.float32) + b1_ref[...]
    inter = jnp.where(z1 >= 0, z1, 0.1 * z1)                        # (TB, I)
    inter_ref[...] = inter

    # ---- linear_2 logits: N=1 output -> VPU multiply + lane reduction ----
    # (b2 add and the sigmoid are applied in the wrapper on the (B,1) output;
    #  partial final batch tiles hold garbage rows, but all math is row-local
    #  and the writeback is masked, so this is benign.)
    logit_ref[...] = jnp.sum(inter * w2_ref[...], axis=-1, keepdims=True)


def pack_params(params):
    """One-time weight packing (do NOT repeat per forward call)."""
    H = params["b_ih"].shape[0] // 4
    D = params["w_ih"].shape[1]
    I = params["b1"].shape[0]

    # PyTorch LSTM gate order in W_ih / biases is [i, f, g, o]; h0 = 0 kills
    # the W_hh term and c0 = 0 makes the forget gate algebraically irrelevant.
    b = params["b_ih"] + params["b_hh"]
    w_ih = params["w_ih"]                                           # (4H, D)
    wi, wg, wo = w_ih[0 * H:1 * H], w_ih[2 * H:3 * H], w_ih[3 * H:4 * H]
    bi, bg, bo = b[0 * H:1 * H], b[2 * H:3 * H], b[3 * H:4 * H]

    # Pack [i | o | g]; pre-scale the sigmoid gates (i, o) by 0.5 so that
    # sigmoid(z) = 0.5*(1 + tanh(z/2)) lets one tanh cover all gates.
    w_gates = jnp.concatenate([0.5 * wi, 0.5 * wo, wg], axis=0).T   # (D, 3H)
    b_gates = jnp.concatenate([0.5 * bi, 0.5 * bo, bg])[None, :]    # (1, 3H)

    # Pad gate width to a lane multiple (exactly one 128-lane tile for H=32).
    gp = ((3 * H + 127) // 128) * 128
    pad = gp - 3 * H
    if pad:
        w_gates = jnp.pad(w_gates, ((0, 0), (0, pad)))
        b_gates = jnp.pad(b_gates, ((0, 0), (0, pad)))

    return {
        "w_gates": w_gates,                       # (D, Gp), i/o cols pre-scaled
        "b_gates": b_gates,                       # (1, Gp), i/o cols pre-scaled
        "w1": params["w1"].T,                     # (H, I)
        "b1": params["b1"][None, :],              # (1, I)
        "w2": params["w2"].reshape(1, I),         # (1, I) row for VPU reduction
        "b2": params["b2"].reshape(()),           # scalar, applied in wrapper
        "hidden_dim": int(H),
        "ts_dim": int(D),
        "inter_dim": int(I),
    }


def lstm_discriminator(x, packed, *, block_b=4096):
    """Returns (out, inter_feature) matching the PyTorch forward.

    out:   (B, 1)          -- sigmoid score per sample (seq_len is 1)
    inter: (B, inter_dim)  -- LeakyReLU features
    """
    assert x.ndim == 2, "kernel assumes the module's seq_len==1 reshape"
    x = x.astype(jnp.float32)
    B, D = x.shape
    H = packed["hidden_dim"]
    I = packed["inter_dim"]
    Gp = packed["w_gates"].shape[1]
    assert D == packed["ts_dim"]

    # Batch tile: multiple of 8 sublanes; when B > 8 keep >= 2 grid steps so
    # v7x's two TensorCores are both used ("parallel" grid axis).  The default
    # block_b=4096 keeps double-buffered lane-padded blocks (~3 KiB/row) plus
    # temporaries comfortably under v7x's 64 MiB VMEM; on v6e you may raise
    # block_b to ~8192 (vmem_limit below already gives headroom).
    if B <= 8:
        TB = B
    else:
        cap = max(8, (block_b // 8) * 8)
        TB = min(cap, ((pl.cdiv(B, 2) + 7) // 8) * 8)
    grid = (pl.cdiv(B, TB),)

    def fixed(shape):  # grid-invariant, VMEM-resident (constant block index)
        return pl.BlockSpec(shape, lambda i: (0, 0))

    kernel = functools.partial(lstm_disc_kernel, hidden_dim=H)

    logits, inter = pl.pallas_call(
        kernel,
        out_shape=(jax.ShapeDtypeStruct((B, 1), jnp.float32),
                   jax.ShapeDtypeStruct((B, I), jnp.float32)),
        grid=grid,
        in_specs=[
            pl.BlockSpec((TB, D), lambda i: (i, 0)),   # x (streamed over batch)
            fixed((D, Gp)),                            # fused, pre-scaled gate weights
            fixed((1, Gp)),                            # fused gate bias
            fixed((H, I)),                             # w1
            fixed((1, I)),                             # b1
            fixed((1, I)),                             # w2 row
        ],
        out_specs=(pl.BlockSpec((TB, 1), lambda i: (i, 0)),
                   pl.BlockSpec((TB, I), lambda i: (i, 0))),
        compiler_params=pltpu.CompilerParams(
            dimension_semantics=("parallel",),
            # Clears v5e's 16 MiB scoped default for large tiles while staying
            # below v7x's 64 MiB physical VMEM (v6e has 128 MiB physical).
            vmem_limit_bytes=48 * 1024 * 1024,
        ),
    )(x, packed["w_gates"], packed["b_gates"], packed["w1"],
      packed["b1"], packed["w2"])

    # Final bias + sigmoid on the (B, 1) column in XLA: a full EUP push with
    # 1/128 useful lanes inside the kernel would have been ~25% of EUP pushes
    # for <1% of the transcendental work.
    out = jax.nn.sigmoid(logits + packed["b2"])
    return out, inter


def reference_forward(x, params):
    """Pure-JAX replica of the PyTorch forward (for correctness check)."""
    H = params["b_ih"].shape[0] // 4
    gates = x @ params["w_ih"].T + params["b_ih"] + params["b_hh"]
    i_g = jax.nn.sigmoid(gates[:, 0 * H:1 * H])
    g_g = jnp.tanh(gates[:, 2 * H:3 * H])
    o_g = jax.nn.sigmoid(gates[:, 3 * H:4 * H])
    h = o_g * jnp.tanh(i_g * g_g)
    z1 = h @ params["w1"].T + params["b1"]
    inter = jnp.where(z1 >= 0, z1, 0.1 * z1)   # module uses LeakyReLU(0.1)
    out = jax.nn.sigmoid(inter @ params["w2"].T + params["b2"])
    return out, inter


def init_params(key, ts_dim, hidden_dim, inter_dim):
    ks = jax.random.split(key, 8)
    s = 1.0 / jnp.sqrt(hidden_dim)
    return {
        "w_ih": jax.random.uniform(ks[0], (4 * hidden_dim, ts_dim), jnp.float32, -s, s),
        "w_hh": jax.random.uniform(ks[1], (4 * hidden_dim, hidden_dim), jnp.float32, -s, s),
        "b_ih": jax.random.uniform(ks[2], (4 * hidden_dim,), jnp.float32, -s, s),
        "b_hh": jax.random.uniform(ks[3], (4 * hidden_dim,), jnp.float32, -s, s),
        "w1": jax.random.uniform(ks[4], (inter_dim, hidden_dim), jnp.float32, -s, s),
        "b1": jax.random.uniform(ks[5], (inter_dim,), jnp.float32, -s, s),
        "w2": jax.random.uniform(ks[6], (1, inter_dim), jnp.float32, -s, s),
        "b2": jax.random.uniform(ks[7], (1,), jnp.float32, -s, s),
    }


if __name__ == "__main__":
    batch, ts_dim, hidden_dim, inter_dim = 16, 8, 32, 64

    key = jax.random.PRNGKey(0)
    k_x, k_p = jax.random.split(key)
    x = jax.random.normal(k_x, (batch, ts_dim), jnp.float32)
    params = init_params(k_p, ts_dim, hidden_dim, inter_dim)

    packed = pack_params(params)                 # one-time packing
    out, inter = lstm_discriminator(x, packed)   # B=16 -> TB=8, grid=(2,) (tiling exercised)
    out = jax.block_until_ready(out)
    inter = jax.block_until_ready(inter)

    ref_out, ref_inter = reference_forward(x, params)
    assert out.shape == (batch, 1) and inter.shape == (batch, inter_dim)
    assert jnp.allclose(out, ref_out, atol=1e-5, rtol=1e-5)
    assert jnp.allclose(inter, ref_inter, atol=1e-5, rtol=1e-5)

    print("KERNEL_OK")
</pallas_src>

<mosaic_0001>
module attributes {stable_mosaic.version = 11 : i64} {
  func.func @lstm_disc_kernel(%arg0: i32, %arg1: memref<8x8xf32, #tpu.memory_space<vmem>>, %arg2: memref<8x128xf32, #tpu.memory_space<vmem>>, %arg3: memref<1x128xf32, #tpu.memory_space<vmem>>, %arg4: memref<32x64xf32, #tpu.memory_space<vmem>>, %arg5: memref<1x64xf32, #tpu.memory_space<vmem>>, %arg6: memref<1x64xf32, #tpu.memory_space<vmem>>, %arg7: memref<8x1xf32, #tpu.memory_space<vmem>>, %arg8: memref<8x64xf32, #tpu.memory_space<vmem>>) attributes {dimension_semantics = [#tpu.dimension_semantics<parallel>], iteration_bounds = array<i64: 2>, scalar_prefetch = 0 : i64, scratch_operands = 0 : i64, tpu.core_type = #tpu.core_type<tc>, window_params = [{transform_indices = @transform_0, window_bounds = array<i64: 8, 8>}, {pipeline_mode = #tpu.pipeline_mode<synchronous>, transform_indices = @transform_1, window_bounds = array<i64: 8, 128>}, {pipeline_mode = #tpu.pipeline_mode<synchronous>, transform_indices = @transform_2, window_bounds = array<i64: 1, 128>}, {pipeline_mode = #tpu.pipeline_mode<synchronous>, transform_indices = @transform_3, window_bounds = array<i64: 32, 64>}, {pipeline_mode = #tpu.pipeline_mode<synchronous>, transform_indices = @transform_4, window_bounds = array<i64: 1, 64>}, {pipeline_mode = #tpu.pipeline_mode<synchronous>, transform_indices = @transform_5, window_bounds = array<i64: 1, 64>}, {transform_indices = @transform_6, window_bounds = array<i64: 8, 1>}, {transform_indices = @transform_7, window_bounds = array<i64: 8, 64>}]} {
    %c0 = arith.constant 0 : index
    %c0_0 = arith.constant 0 : index
    %0 = vector.load %arg1[%c0, %c0_0] : memref<8x8xf32, #tpu.memory_space<vmem>>, vector<8x8xf32>
    %c0_1 = arith.constant 0 : index
    %c0_2 = arith.constant 0 : index
    %1 = vector.load %arg2[%c0_1, %c0_2] : memref<8x128xf32, #tpu.memory_space<vmem>>, vector<8x128xf32>
    %cst = arith.constant dense<0.000000e+00> : vector<8x128xf32>
    %2 = tpu.matmul %0, %1, %cst {dimension_numbers = #tpu.dot_dimension_numbers<[1], [0], [0], [1], [0, 0, 1, 1], [], []>} : vector<8x8xf32>, vector<8x128xf32>, vector<8x128xf32> -> vector<8x128xf32>
    %c0_3 = arith.constant 0 : index
    %c0_4 = arith.constant 0 : index
    %3 = vector.load %arg3[%c0_3, %c0_4] : memref<1x128xf32, #tpu.memory_space<vmem>>, vector<1x128xf32>
    %4 = vector.broadcast %3 : vector<1x128xf32> to vector<8x128xf32>
    %5 = arith.addf %2, %4 : vector<8x128xf32>
    %6 = math.tanh %5 : vector<8x128xf32>
    %7 = vector.extract_strided_slice %6 {offsets = [0, 0], sizes = [8, 64], strides = [1, 1]} : vector<8x128xf32> to vector<8x64xf32>
    %cst_5 = arith.constant 5.000000e-01 : f32
    %8 = vector.broadcast %cst_5 : f32 to vector<8x64xf32>
    %9 = arith.mulf %8, %7 : vector<8x64xf32>
    %cst_6 = arith.constant 5.000000e-01 : f32
    %10 = vector.broadcast %cst_6 : f32 to vector<8x64xf32>
    %11 = arith.addf %9, %10 : vector<8x64xf32>
    %12 = vector.extract_strided_slice %11 {offsets = [0, 0], sizes = [8, 32], strides = [1, 1]} : vector<8x64xf32> to vector<8x32xf32>
    %13 = vector.extract_strided_slice %11 {offsets = [0, 32], sizes = [8, 32], strides = [1, 1]} : vector<8x64xf32> to vector<8x32xf32>
    %14 = vector.extract_strided_slice %6 {offsets = [0, 64], sizes = [8, 32], strides = [1, 1]} : vector<8x128xf32> to vector<8x32xf32>
    %15 = arith.mulf %12, %14 : vector<8x32xf32>
    %16 = math.tanh %15 : vector<8x32xf32>
    %17 = arith.mulf %13, %16 : vector<8x32xf32>
    %c0_7 = arith.constant 0 : index
    %c0_8 = arith.constant 0 : index
    %18 = vector.load %arg4[%c0_7, %c0_8] : memref<32x64xf32, #tpu.memory_space<vmem>>, vector<32x64xf32>
    %cst_9 = arith.constant dense<0.000000e+00> : vector<8x64xf32>
    %19 = tpu.matmul %17, %18, %cst_9 {dimension_numbers = #tpu.dot_dimension_numbers<[1], [0], [0], [1], [0, 0, 1, 1], [], []>} : vector<8x32xf32>, vector<32x64xf32>, vector<8x64xf32> -> vector<8x64xf32>
    %c0_10 = arith.constant 0 : index
    %c0_11 = arith.constant 0 : index
    %20 = vector.load %arg5[%c0_10, %c0_11] : memref<1x64xf32, #tpu.memory_space<vmem>>, vector<1x64xf32>
    %21 = vector.broadcast %20 : vector<1x64xf32> to vector<8x64xf32>
    %22 = arith.addf %19, %21 : vector<8x64xf32>
    %cst_12 = arith.constant 0.000000e+00 : f32
    %23 = vector.broadcast %cst_12 : f32 to vector<8x64xf32>
    %24 = arith.cmpf oge, %22, %23 : vector<8x64xf32>
    %cst_13 = arith.constant 1.000000e-01 : f32
    %25 = vector.broadcast %cst_13 : f32 to vector<8x64xf32>
    %26 = arith.mulf %25, %22 : vector<8x64xf32>
    %27 = arith.select %24, %22, %26 : vector<8x64xi1>, vector<8x64xf32>
    %c0_14 = arith.constant 0 : index
    %c0_15 = arith.constant 0 : index
    %28 = vector.load %arg8[%c0_14, %c0_15] : memref<8x64xf32, #tpu.memory_space<vmem>>, vector<8x64xf32>
    tpu.vector_store %arg8[%c0_14, %c0_15], %27 {strides = array<i32>} : memref<8x64xf32, #tpu.memory_space<vmem>>, vector<8x64xf32>,
    %c0_16 = arith.constant 0 : index
    %c0_17 = arith.constant 0 : index
    %29 = vector.load %arg6[%c0_16, %c0_17] : memref<1x64xf32, #tpu.memory_space<vmem>>, vector<1x64xf32>
    %30 = vector.broadcast %29 : vector<1x64xf32> to vector<8x64xf32>
    %31 = arith.mulf %27, %30 : vector<8x64xf32>
    %cst_18 = arith.constant dense<0.000000e+00> : vector<8xf32>
    %32 = vector.multi_reduction <add>, %31, %cst_18 [1] : vector<8x64xf32> to vector<8xf32>
    %33 = vector.shape_cast %32 : vector<8xf32> to vector<8x1xf32>
    %c0_19 = arith.constant 0 : index
    %c0_20 = arith.constant 0 : index
    %34 = vector.load %arg7[%c0_19, %c0_20] : memref<8x1xf32, #tpu.memory_space<vmem>>, vector<8x1xf32>
    tpu.vector_store %arg7[%c0_19, %c0_20], %33 {strides = array<i32>} : memref<8x1xf32, #tpu.memory_space<vmem>>, vector<8x1xf32>,
    return
  }
  func.func @transform_0(%arg0: i32) -> (i32, i32) {
    %c0_i32 = arith.constant 0 : i32
    %c0_i32_0 = arith.constant 0 : i32
    return %arg0, %c0_i32 : i32, i32
  }
  func.func @transform_1(%arg0: i32) -> (i32, i32) {
    %c0_i32 = arith.constant 0 : i32
    %c0_i32_0 = arith.constant 0 : i32
    %c0_i32_1 = arith.constant 0 : i32
    return %c0_i32, %c0_i32_0 : i32, i32
  }
  func.func @transform_2(%arg0: i32) -> (i32, i32) {
    %c0_i32 = arith.constant 0 : i32
    %c0_i32_0 = arith.constant 0 : i32
    %c0_i32_1 = arith.constant 0 : i32
    return %c0_i32, %c0_i32_0 : i32, i32
  }
  func.func @transform_3(%arg0: i32) -> (i32, i32) {
    %c0_i32 = arith.constant 0 : i32
    %c0_i32_0 = arith.constant 0 : i32
    %c0_i32_1 = arith.constant 0 : i32
    return %c0_i32, %c0_i32_0 : i32, i32
  }
  func.func @transform_4(%arg0: i32) -> (i32, i32) {
    %c0_i32 = arith.constant 0 : i32
    %c0_i32_0 = arith.constant 0 : i32
    %c0_i32_1 = arith.constant 0 : i32
    return %c0_i32, %c0_i32_0 : i32, i32
  }
  func.func @transform_5(%arg0: i32) -> (i32, i32) {
    %c0_i32 = arith.constant 0 : i32
    %c0_i32_0 = arith.constant 0 : i32
    %c0_i32_1 = arith.constant 0 : i32
    return %c0_i32, %c0_i32_0 : i32, i32
  }
  func.func @transform_6(%arg0: i32) -> (i32, i32) {
    %c0_i32 = arith.constant 0 : i32
    %c0_i32_0 = arith.constant 0 : i32
    return %arg0, %c0_i32 : i32, i32
  }
  func.func @transform_7(%arg0: i32) -> (i32, i32) {
    %c0_i32 = arith.constant 0 : i32
    %c0_i32_0 = arith.constant 0 : i32
    return %arg0, %c0_i32 : i32, i32
  }
}

</mosaic_0001>

<bundles_post_ra>
// kernel: tpu_custom_call.1
= control target key start
LH: loop header
LB: loop body
LE: loop exit
PB: predicated region body
PF: predicated region fallthrough
CT: control target
= control target key end

     0   :  { %13 = vsyncpa [#allocation3], 0  ;;  %s988_s0 = inlined_call_operand.vmem [shape: f32[16,8], index: 0, kind: input, shape index: {}]   ;;  %s989_s1 = inlined_call_operand.vmem [shape: f32[8,128], index: 1, kind: input, shape index: {}]   ;;  %s990_s2 = inlined_call_operand.vmem [shape: f32[1,128], index: 2, kind: input, shape index: {}]   ;;  %s991_s3 = inlined_call_operand.hbm [shape: f32[32,64], index: 3, kind: input, shape index: {}]   ;;  %s992_s4 = inlined_call_operand.vmem [shape: f32[1,64], index: 4, kind: input, shape index: {}]   ;;  %s993_s5 = inlined_call_operand.vmem [shape: f32[1,64], index: 5, kind: input, shape index: {}]   ;;  %s994_s6 = inlined_call_operand.vmem [shape: f32[16,1], index: 6, kind: output, shape index: {0}]   ;;  %s995_s7 = inlined_call_operand.hbm [shape: f32[16,64], index: 7, kind: output, shape index: {1}]  }
   0x1   :  { %14 = vsyncpa [#allocation4], 0 }
   0x2   :  { %16 = vsyncpa [#allocation4 + $0x1], 0  ;;  %s861_s24 = smov 0   ;;  %s863_s25 = smov 0  }
   0x3   :  { %s865_s26 = smov 0   ;;  %s867_s27 = smov 0  }
   0x4 LB: > { %s882_s28 = sadd.s32 4294967295, %s810_s27   ;;  %s618_s29 = sadd.s32 4294967294, %s810_s27   ;;  %s810_s27 = sphi %s867_s27, %s1003_s27   ;;  %s806_s26 = sphi %s865_s26, %s1002_s26   ;;  %s802_s25 = sphi %s863_s25, %s1001_s25   ;;  %s798_s24 = sphi %s861_s24, %s1000_s24  }
   0x5   : > { %s886_s30 = sadd.s32 1, %s810_s27   ;;  %s186_s8 = sadd.s32 1, %s806_s26 }
   0x6   : > { %s183_s9 = ssub.s32 %s810_s27, %s886_s30  ;;  %p196_p0 = scmp.ne.s32.totalorder %s806_s26, %s802_s25 }
   0x7   : > { %p184_p1 = scmp.eq.s32.totalorder %s183_s9, 0  ;;  %p197_p2 = scmp.eq.s32.totalorder %s882_s28, 1 }
   0x8   : > { %p202_p3 = scmp.ne.s32.totalorder %s802_s25, %s798_s24  ;;  %p203_p4 = scmp.eq.s32.totalorder %s618_s29, 1 }
   0x9   : > { %s897_s10 = scalar_select %p184_p1, %s806_s26, %s186_s8  }
   0xa   : > { %p899_p5 = por %p197_p2, %p196_p0  ;;  %p903_p6 = por %p203_p4, %p202_p3 }
   0xb   : > { %p619_p7 = scmp.ge.s32.totalorder %s810_s27, 1  ;;  %p210_p8 = scmp.lt.s32.totalorder %s810_s27, 3 }
   0xc   : > { %s997_s12 = scalar_select %p903_p6, 1, 0 }
   0xd   : > { %p673_p9 = scmp.eq.s32.totalorder %s882_s28, 0  ;;  %p910_p10 = pnand %p619_p7, %p210_p8 }
   0xe   : > { %s812_s14 = smov [#allocation2]  }
   0xf   : > { %s228_s15 = sshll.u32 %s812_s14, 4  ;;  %p665_p11 = pneg %p910_p10  ;;  %s229_s15 = int_to_ptr.vmem [resolvable:$true] %s228_s15 }
  0x10   : > { %s731_s16 = scalar_lea.vmem %s229_s15, 512  ;;  %p739_p3 = scmp.lt.s32.totalorder %s229_s15, %s229_s15 }
  0x11   : > { %p666_p12 = pnand %p673_p9, %p665_p11  ;;  %p732_p0 = scmp.ne.s32.totalorder %s229_s15, %s731_s16 }
  0x12   : > { %p740_p4 = scmp.lt.s32.totalorder %s731_s16, %s731_s16 }
  0x13   : > { %p722_p13 = pneg %p666_p12 }
  0x14   : > { %p741_p6 = por %p740_p4, %p739_p3 }
  0x15   : > { %p734_p1 = pnand %p732_p0, %p722_p13 }
  0x17   : > { %p735_p2 = pneg %p734_p1 }
  0x19   : > { %p742_p7 = pnand %p741_p6, %p735_p2 }
  0x1b   : > { %745 = shalt.err (!%p742_p7)
}
  0x1c   : > { %s813_s17 = smov 128   ;;  %s814_s18 = smov 8  }
  0x1d   : > { %668 = dma.hbm_to_vmem [thread:$0]  (!%p666_p12), %s991_s3, 512, %s229_s15, [#allocation3], %s813_s17, %s813_s17, %s814_s18  }
  0x1e   : > { %257 = sbr.rel (%p910_p10) target bundleno = 955 (0x3bb), region = 44 }
  0x23   : > { %789 = dma.done.wait (%p673_p9), [#allocation3], 512  }
  0x24   : > { %791 = vsyncadd (%p673_p9), [#allocation3], 4294966784  ;;  %p292_p8 = scmp.lt.s32.totalorder %s882_s28, 1  ;;  %v815_v0 = vmov 0.0   ;;  %vm816_vm0 = vmmov 0   ;;  %vm309_vm1 = vcmask 64512  }
  0x25   : > { %643 = vmatprep.subr.mxu0 %v815_v0  ;;  %645 = vmatprep.mubr.msk.f32.mxu0 %vm816_vm0, %v815_v0  ;;  %v301_v1 = vld [vmem:[%s989_s1] sm:$0xff]  ;;  %s817_s16 = smov 64   ;;  %v400_v12 = vld [vmem:[#allocation2 + $0x18] sm:$0xff]  ;;  %v399_v13 = vld [vmem:[#allocation2 + $0x10] sm:$0xff]  ;;  %s818_s17 = smov 32   ;;  %vm411_vm2 = vcmask 261120  }
  0x26   : > { %s929_s21 = scalar_select %p292_p8, %s882_s28, 1  ;;  %648 = vmatprep.subr.mxu1 %v815_v0  ;;  %656 = vmatprep.mubr.msk.f32.mxu1 %vm816_vm0, %v815_v0  ;;  %v627_v3 = vld [vmem:[%s990_s2] ss:$0 sm:$0xff]  ;;  %v398_v14 = vld [vmem:[#allocation2 + $0x8] sm:$0xff]  ;;  %vm487_vm4 = vcmask 523264  }
  0x27   : > { %644 = vmatpush3.msra.mxu0 %v301_v1  ;;  %649 = vmatpush3.msra.mxu1 %v400_v12  ;;  %v397_v15 = vld [vmem:[#allocation2] sm:$0xff]  ;;  %s819_s18 = smov 96   ;;  %s289_s19 = sand.u32 1, %s802_s25  }
  0x28   : > { %s625_s22 = sshll.u32 %s929_s21, 3  ;;  %650 = vmatprep.subr.mxu1 %v815_v0  ;;  %v629_v20 = vld [vmem:[%s992_s4] ss:$0 sm:$0xff]  ;;  %s624_s29 = sshll.u32 %s289_s19, 3 }
  0x29   : > { %s295_s8 = scalar_lea.vmem %s988_s0, %s625_s22  ;;  %651 = vmatpush3.msra.mxu1 %v399_v13  ;;  %v631_v25 = vld [vmem:[%s993_s5] ss:$0 sm:$0xff]  ;;  %s291_s13 = scalar_lea.vmem [#allocation5], %s624_s29 }
  0x2a   : > { %v300_v2 = vld [vmem:[%s295_s8] sm:$0xff]  ;;  %652 = vmatprep.subr.mxu1 %v815_v0  ;;  %s633_s14 = sshll.u32 %s882_s28, 7  ;;  %s523_s15 = sshll.u32 %s291_s13, 4  ;;  %s524_s15 = int_to_ptr.vmem [resolvable:$true] %s523_s15 }
  0x2b   : > { %646 = vmatmul.mubr.msk.f32.vlgmr.msra.gmra.mxu0 %vm309_vm1, %v300_v2  ;;  %653 = vmatpush3.msra.mxu1 %v398_v14  ;;  %s507_s20 = scalar_lea.sflag [#allocation4], %s289_s19  ;;  %s746_s23 = scalar_lea.vmem %s524_s15, 128 }
  0x2c   : > { %654 = vmatprep.subr.mxu1 %v815_v0  ;;  %p747_p6 = scmp.ne.s32.totalorder %s524_s15, %s746_s23  ;;  %s820_s8 = smov [#allocation5]  }
  0x2d   : > { %655 = vmatpush3.msra.mxu1 %v397_v15  ;;  %s750_s9 = sshll.u32 %s820_s8, 4  ;;  %s751_s9 = int_to_ptr.vmem [resolvable:$false] %s750_s9 }
  0x2e   : > { %p748_p9 = pnand %p747_p6, %p899_p5  ;;  %s752_s29 = scalar_lea.vmem %s751_s9, 256 }
  0x2f   : > { %p753_p11 = scmp.lt.s32.totalorder %s524_s15, %s751_s9  ;;  %p754_p12 = scmp.lt.s32.totalorder %s752_s29, %s746_s23 }
  0x30   : > { %p749_p10 = pneg %p748_p9 }
  0x31   : > { %p755_p13 = por %p754_p12, %p753_p11 }
  0x33   : > { %p756_p0 = pnand %p755_p13, %p749_p10 }
  0xeb   : > { %v379_v4 = vpop.f32.mrf.mxu0 }
  0xec   : > { %v380_v5 = vadd.f32 %v627_v3, %v379_v4 }
  0xed   : > { %v647_v6 = vpop.f32.mrf.mxu0 }
  0xee   : > { %716 = vtanh.f32 %v380_v5 }
  0xfb   : > { %v717_v7 = vpop.eup %716 }
  0xfc   : > { %387 = vrot.lane.b32.xlu0 %v717_v7, %s817_s16  ;;  %v384_v8 = vmul.f32 0.5, %v717_v7 }
  0xfe   : > { %v385_v9 = vadd.f32 0.5, %v384_v8 }
 0x16e   : > { %v388_v10 = vpop.permute.xlu0 %387 }
 0x16f   : > { %v390_v11 = vmul.f32 %v388_v10, %v385_v9 }
 0x171   : > { %718 = vtanh.f32 %v390_v11 }
 0x17e   : > { %v719_v16 = vpop.eup %718 }
 0x17f   : > { %393 = vrot.lane.b32.xlu0 %v719_v16, %s818_s17 }
 0x1f1   : > { %v394_v17 = vpop.permute.xlu0 %393 }
 0x1f2   : > { %v396_v18 = vmul.f32 %v394_v17, %v385_v9 }
 0x1f4   : > { %409 = vrot.lane.b32.xlu1 %v396_v18, %s819_s18  ;;  %s521_s18 = scalar_lea.hbm %s995_s7, %s633_s14 }
 0x266   : > { %v410_v19 = vpop.permute.xlu1 %409 }
 0x267   : > { %657 = vmatmul.mubr.msk.f32.vlgmr.msra.gmra.mxu1 %vm411_vm2, %v410_v19 }
 0x327   : > { %v480_v21 = vpop.f32.mrf.mxu1 }
 0x328   : > { %v481_v22 = vadd.f32 %v629_v20, %v480_v21 }
 0x329   : > { %v658_v23 = vpop.f32.mrf.mxu1 }
 0x32a   : > { %vm484_vm3 = vcmp.ge.f32.partialorder %v481_v22, 0.0  ;;  %v485_v24 = vmul.f32 0.1, %v481_v22 }
 0x32c   : > { %v486_v26 = vsel %vm484_vm3, %v481_v22, %v485_v24 }
 0x32d   : > { %v496_v27 = vmul.f32 %v631_v25, %v486_v26  ;;  %488 = vst.msk [vmem:[%s291_s13] sm:$0xff] %vm487_vm4, %v486_v26 }
 0x32f   : > { %v497_v28 = vsel %vm487_vm4, %v496_v27, 0.0 }
 0x330   : > { %498 = vadd.xlane.f32.xlu1 %v497_v28 }
 0x331   : > { %759 = shalt.err (!%p756_p0)
}
 0x332   : > { %s760_s28 = scalar_lea.hbm %s521_s18, 128  ;;  %s764_s14 = scalar_lea.hbm %s995_s7, 256 }
 0x333   : > { %p761_p1 = scmp.ne.s32.totalorder %s521_s18, %s760_s28  ;;  %p765_p4 = scmp.lt.s32.totalorder %s521_s18, %s995_s7 }
 0x334   : > { %p766_p7 = scmp.lt.s32.totalorder %s764_s14, %s760_s28 }
 0x335   : > { %p762_p2 = pnand %p761_p1, %p899_p5 }
 0x336   : > { %p767_p8 = por %p766_p7, %p765_p4 }
 0x337   : > { %p763_p3 = pneg %p762_p2 }
 0x339   : > { %p768_p6 = pnand %p767_p8, %p763_p3 }
 0x33b   : > { %771 = shalt.err (!%p768_p6)
}
 0x33c   : > { %663 = dma.vmem_to_hbm [thread:$0]  (%p899_p5), %s524_s15, 128, %s521_s18, %s507_s20   ;;  %vm500_vm5 = vcmask 7168  }
 0x33d   : > { %s299_s9 = scalar_lea.vmem %s994_s6, %s625_s22 }
 0x3b9   : > { %v499_v29 = vpop.xlane.xlu1 %498 }
 0x3ba   : > { %501 = vst.msk [vmem:[%s299_s9] sm:$0xff] %vm500_vm5, %v499_v29 }
 0x3bb PF: > { %p675_p9 = scmp.ge.s32.totalorder %s810_s27, 2  ;;  %s542_s29 = sand.u32 1, %s798_s24  }
 0x3bc   : > { %p999_p10 = scmp.ne.s32.totalorder %s997_s12, 0  ;;  %s543_s11 = scalar_lea.sflag [#allocation4], %s542_s29 }
 0x3be   : > { %p670_p11 = pnand %p675_p9, %p999_p10 }
 0x3c0   : > { %p671_p12 = pneg %p670_p11 }
 0x3c2   : > { %793 = dma.done.wait (%p671_p12), %s543_s11, 128  }
 0x3c3   : > { %795 = vsyncadd (%p671_p12), %s543_s11, 4294967168  ;;  %p19_p5 = scmp.ge.s32.totalorder %s886_s30, 4   ;;  %s1000_s24 = smov %s802_s25 }
 0x3c4   : > { %s1001_s25 = smov %s806_s26  ;;  %s1002_s26 = smov %s897_s10 }
 0x3c5   : > { %s1003_s27 = smov %s886_s30  ;;  %21 = sbr.rel (!%p19_p5) target bundleno = 4 (0x4), region = 96 }
 0x3ca   :  { %548 = vsyncpa [#allocation3], 1 }
 0x3cb   :  { %550 = vsyncpa [#allocation3 + $0x1], 1 }
 0x3cc   :  { %551 = vsyncpa [#allocation4], 1 }
 0x3cd   :  { %553 = vsyncpa [#allocation4 + $0x1], 1 }

</bundles_post_ra>
